<compile_context>
chip_gen: v5e
topology: v5e:2x2
jax: 0.10.0
libtpu: 0.0.40
codegen_flags: <defaults>
</compile_context>

<pallas_src>
import math

import jax
import jax.numpy as jnp
from jax.experimental import pallas as pl
from jax.experimental.pallas import tpu as pltpu


_SQRT_2_OVER_PI = math.sqrt(2.0 / math.pi)
_GELU_COEFF = 0.044715

_LANE = 128


def _round_down(a, m):
    return (a // m) * m


def _round_up(a, m):
    return ((a + m - 1) // m) * m


def _tpu_budget():
    """Return (physical_vmem_bytes, num_tensorcores) with safe fallbacks."""
    vmem_bytes = 64 << 20  # conservative default (v7x physical VMEM)
    num_tc = 2             # conservative default: assume megacore (split helps)
    try:
        info = pltpu.get_tpu_info()
        v = getattr(info, "vmem_capacity_bytes", None)
        if v:
            vmem_bytes = int(v)
    except Exception:
        pass
    try:
        kind = jax.devices()[0].device_kind.lower()
        single_core = any(s in kind for s in ("v5 lite", "v5e", "v6 lite", "v6e"))
        multi_core = any(s in kind for s in ("v4", "v5p", "v7", "7x"))
        if multi_core:
            num_tc = 2
        elif single_core:
            num_tc = 1
    except Exception:
        pass
    return vmem_bytes, num_tc


def _new_gelu_kernel(x_ref, o_ref):
    # Always compute in f32 (free: op is HBM-bound; avoids bf16 emulation on
    # v5e and matches the f32 reference exactly).
    xf = x_ref[...].astype(jnp.float32)
    # Folded polynomial: 0.5*x*(1 + tanh(c * x * (1 + 0.044715*x^2)))
    inner = _SQRT_2_OVER_PI * xf * (1.0 + _GELU_COEFF * (xf * xf))
    o_ref[...] = (0.5 * xf * (1.0 + jnp.tanh(inner))).astype(o_ref.dtype)


def _gelu_jnp(x):
    """Plain-XLA fallback for tiny tails (< 128 elements)."""
    xf = x.astype(jnp.float32)
    y = 0.5 * xf * (1.0 + jnp.tanh(_SQRT_2_OVER_PI * xf * (1.0 + _GELU_COEFF * xf * xf)))
    return y.astype(x.dtype)


def _new_gelu_flat(x_flat):
    """Pallas GELU on a flat array whose length is a multiple of 128."""
    n = x_flat.shape[0]
    dtype_bytes = jnp.dtype(x_flat.dtype).itemsize
    sublane = {4: 8, 2: 16, 1: 32}.get(dtype_bytes, 8)

    # Lane-dense 2D view: widest power-of-two multiple of 128 that divides n.
    cols = _LANE
    for c in (4096, 2048, 1024, 512, 256, _LANE):
        if n % c == 0:
            cols = c
            break
    rows = n // cols
    x2d = x_flat.reshape(rows, cols)

    vmem_bytes, num_tc = _tpu_budget()
    # ~5.3 MiB blocks on v7x (64 MiB VMEM), 8 MiB on v5e/v6e (128 MiB VMEM).
    target_block_bytes = max(2 << 20, min(8 << 20, vmem_bytes // 12))

    tile_rows = max(sublane,
                    _round_down(target_block_bytes // (cols * dtype_bytes), sublane))
    tile_rows = min(tile_rows, rows)

    # Megacore-aware split: only on multi-TC chips, and aim for >=4 blocks so
    # each TensorCore gets >=2 grid steps (keeps DMA/compute overlapped).
    num_blocks = pl.cdiv(rows, tile_rows)
    if num_tc >= 2 and num_blocks <= 2:
        if rows >= 4 * sublane:
            tile_rows = _round_up(pl.cdiv(rows, 4), sublane)
        elif rows >= 2 * sublane:
            tile_rows = _round_up(pl.cdiv(rows, 2), sublane)

    grid = (pl.cdiv(rows, tile_rows),)

    # 2 arrays x 2 pipeline buffers x block + headroom.
    block_bytes = tile_rows * cols * dtype_bytes
    vmem_limit = int(max(16 << 20, 4 * block_bytes + (4 << 20)))

    cost = pl.CostEstimate(
        flops=8 * n,
        transcendentals=n,
        bytes_accessed=2 * n * dtype_bytes,
    )

    out2d = pl.pallas_call(
        _new_gelu_kernel,
        out_shape=jax.ShapeDtypeStruct((rows, cols), x_flat.dtype),
        grid_spec=pltpu.PrefetchScalarGridSpec(
            num_scalar_prefetch=0,
            grid=grid,
            in_specs=[pl.BlockSpec((tile_rows, cols), lambda i: (i, 0))],
            out_specs=pl.BlockSpec((tile_rows, cols), lambda i: (i, 0)),
        ),
        compiler_params=pltpu.CompilerParams(
            dimension_semantics=("parallel",),
            vmem_limit_bytes=vmem_limit,
        ),
        cost_estimate=cost,
    )(x2d)

    return out2d.reshape(-1)


def new_gelu(x):
    """Apply NewGELU elementwise; works for any shape/dtype."""
    orig_shape = x.shape
    n = x.size
    if n == 0:
        return x

    x_flat = x.reshape(-1)
    bulk = _round_down(n, _LANE)

    if bulk == 0:
        # Tiny input (< 128 elements): a kernel launch is pure overhead.
        return _gelu_jnp(x_flat).reshape(orig_shape)

    if bulk == n:
        # Common case (transformer activations): zero-copy, single kernel.
        y_flat = _new_gelu_flat(x_flat)
    else:
        # Odd-size edge path: kernel on the 128-aligned bulk, tiny tail in XLA.
        y_bulk = _new_gelu_flat(x_flat[:bulk])
        y_tail = _gelu_jnp(x_flat[bulk:])
        y_flat = jnp.concatenate([y_bulk, y_tail])

    return y_flat.reshape(orig_shape)


def _new_gelu_ref(x):
    xf = x.astype(jnp.float32)
    y = 0.5 * xf * (1.0 + jnp.tanh(_SQRT_2_OVER_PI * (xf + _GELU_COEFF * xf**3)))
    return y.astype(x.dtype)


if __name__ == "__main__":
    # Small shape consistent with a transformer MLP activation: (batch, seq, hidden)
    B, S, H = 2, 8, 32
    x = jax.random.normal(jax.random.PRNGKey(0), (B, S, H), dtype=jnp.float32)
    y = new_gelu(x)
    jax.block_until_ready(y)
    y_ref = _new_gelu_ref(x)
    assert y.shape == x.shape and y.dtype == x.dtype
    assert jnp.allclose(y, y_ref, atol=1e-5, rtol=1e-5), "mismatch vs reference (f32)"

    # bf16 input: kernel computes in f32 internally, matching the reference.
    xb = jax.random.normal(jax.random.PRNGKey(1), (2, 8, 128), dtype=jnp.bfloat16)
    yb = new_gelu(xb)
    jax.block_until_ready(yb)
    yb_ref = _new_gelu_ref(xb)
    assert yb.dtype == xb.dtype
    assert jnp.allclose(yb.astype(jnp.float32), yb_ref.astype(jnp.float32),
                        atol=2e-2, rtol=2e-2), "mismatch vs reference (bf16)"

    # Odd total size (not a multiple of 128) exercises the bulk + tail path.
    x2 = jax.random.normal(jax.random.PRNGKey(2), (3, 7, 50), dtype=jnp.float32)
    y2 = new_gelu(x2)
    jax.block_until_ready(y2)
    assert jnp.allclose(y2, _new_gelu_ref(x2), atol=1e-5, rtol=1e-5), "mismatch (odd shape)"

    print("KERNEL_OK")
</pallas_src>

<mosaic_0001>
module attributes {stable_mosaic.version = 11 : i64} {
  func.func @_new_gelu_kernel(%arg0: i32, %arg1: memref<1x512xf32, #tpu.memory_space<vmem>>, %arg2: memref<1x512xf32, #tpu.memory_space<vmem>>) attributes {dimension_semantics = [#tpu.dimension_semantics<parallel>], iteration_bounds = array<i64: 1>, scalar_prefetch = 0 : i64, scratch_operands = 0 : i64, tpu.core_type = #tpu.core_type<tc>, window_params = [{transform_indices = @transform_0, window_bounds = array<i64: 1, 512>}, {transform_indices = @transform_1, window_bounds = array<i64: 1, 512>}]} {
    %c0 = arith.constant 0 : index
    %c0_0 = arith.constant 0 : index
    %0 = vector.load %arg1[%c0, %c0_0] : memref<1x512xf32, #tpu.memory_space<vmem>>, vector<1x512xf32>
    %cst = arith.constant 0.797884583 : f32
    %1 = vector.broadcast %cst : f32 to vector<1x512xf32>
    %2 = arith.mulf %1, %0 : vector<1x512xf32>
    %3 = arith.mulf %0, %0 : vector<1x512xf32>
    %cst_1 = arith.constant 4.471500e-02 : f32
    %4 = vector.broadcast %cst_1 : f32 to vector<1x512xf32>
    %5 = arith.mulf %4, %3 : vector<1x512xf32>
    %cst_2 = arith.constant 1.000000e+00 : f32
    %6 = vector.broadcast %cst_2 : f32 to vector<1x512xf32>
    %7 = arith.addf %6, %5 : vector<1x512xf32>
    %8 = arith.mulf %2, %7 : vector<1x512xf32>
    %cst_3 = arith.constant 5.000000e-01 : f32
    %9 = vector.broadcast %cst_3 : f32 to vector<1x512xf32>
    %10 = arith.mulf %9, %0 : vector<1x512xf32>
    %11 = math.tanh %8 : vector<1x512xf32>
    %cst_4 = arith.constant 1.000000e+00 : f32
    %12 = vector.broadcast %cst_4 : f32 to vector<1x512xf32>
    %13 = arith.addf %12, %11 : vector<1x512xf32>
    %14 = arith.mulf %10, %13 : vector<1x512xf32>
    %c0_5 = arith.constant 0 : index
    %c0_6 = arith.constant 0 : index
    %15 = vector.load %arg2[%c0_5, %c0_6] : memref<1x512xf32, #tpu.memory_space<vmem>>, vector<1x512xf32>
    tpu.vector_store %arg2[%c0_5, %c0_6], %14 {strides = array<i32>} : memref<1x512xf32, #tpu.memory_space<vmem>>, vector<1x512xf32>,
    return
  }
  func.func @transform_0(%arg0: i32) -> (i32, i32) {
    %c0_i32 = arith.constant 0 : i32
    %c0_i32_0 = arith.constant 0 : i32
    return %arg0, %c0_i32 : i32, i32
  }
  func.func @transform_1(%arg0: i32) -> (i32, i32) {
    %c0_i32 = arith.constant 0 : i32
    %c0_i32_0 = arith.constant 0 : i32
    return %arg0, %c0_i32 : i32, i32
  }
}

</mosaic_0001>

<bundles_post_ra>
// kernel: tpu_custom_call.1
= control target key start
LH: loop header
LB: loop body
LE: loop exit
PB: predicated region body
PF: predicated region fallthrough
CT: control target
= control target key end

     0   :  { %6 = vsyncpa [#allocation3], 0  ;;  %s129_s0 = inlined_call_operand.hbm [shape: f32[1,512], index: 0, kind: input, shape index: {}]   ;;  %s130_s1 = inlined_call_operand.hbm [shape: f32[1,512], index: 1, kind: output, shape index: {}]  }
   0x1   :  { %7 = vsyncpa [#allocation4], 0  ;;  %s13_s8 = sshll.u32 %s129_s0, 4  ;;  %s111_s9 = smov [#allocation2]   ;;  %s14_s8 = int_to_ptr.hbm [resolvable:$true] %s13_s8 }
   0x2   :  { %s15_s10 = sshll.u32 %s111_s9, 4  ;;  %s16_s10 = int_to_ptr.vmem [resolvable:$true] %s15_s10 }
   0x3   :  { %18 = dma.hbm_to_vmem [thread:$0]  %s14_s8, 64, %s16_s10, [#allocation3]  }
   0x4   :  { %107 = dma.done.wait [#allocation3], 64  }
   0x5   :  { %108 = vsyncadd [#allocation3], 4294967232  ;;  %v23_v0 = vld [vmem:[#allocation2] sm:$0xf]  ;;  %v33_v6 = vlaneseq  ;;  %s112_s11 = smov [#allocation5]   ;;  %s45_s14 = sshll.u32 %s130_s1, 4  ;;  %s46_s14 = int_to_ptr.hbm [resolvable:$true] %s45_s14 }
   0x6   :  { %v25_v1 = vmul.f32 %v23_v0, %v23_v0  ;;  %v24_v2 = vmul.f32 0.7978846, %v23_v0  ;;  %v29_v7 = vmul.f32 0.5, %v23_v0  ;;  %s43_s12 = sshll.u32 %s112_s11, 4  ;;  %s44_s12 = int_to_ptr.vmem [resolvable:$true] %s43_s12 }
   0x7   :  { %vm35_vm0 = vcmp.lt.s32.totalorder %v33_v6, 512 }
   0x8   :  { %v26_v3 = vmul.f32 0.044715, %v25_v1 }
   0xa   :  { %v27_v4 = vadd.f32 1.0, %v26_v3 }
   0xc   :  { %v28_v5 = vmul.f32 %v27_v4, %v24_v2 }
   0xe   :  { %57 = vtanh.f32 %v28_v5 }
  0x14   :  { %v58_v8 = vpop.eup %57 }
  0x15   :  { %v31_v9 = vadd.f32 1.0, %v58_v8 }
  0x17   :  { %v32_v10 = vmul.f32 %v31_v9, %v29_v7 }
  0x19   :  { %37 = vst.msk [vmem:[#allocation5] sm:$0xf] %vm35_vm0, %v32_v10 }
  0x1a   :  { %48 = dma.vmem_to_hbm [thread:$0]  %s44_s12, 64, %s46_s14, [#allocation4]  }
  0x1b   :  { %109 = dma.done.wait [#allocation4], 64  }
  0x1c   :  { %110 = vsyncadd [#allocation4], 4294967232 }
  0x1d   :  { %53 = vsyncpa [#allocation3], 1 }
  0x1e   :  { %54 = vsyncpa [#allocation4], 1 }

</bundles_post_ra>
